<compile_context>
chip_gen: v6e
topology: v6e:2x2x1
jax: 0.10.0
libtpu: 0.0.40
codegen_flags: <defaults>
</compile_context>

<pallas_src>
import functools
import math

import jax
import jax.numpy as jnp
from jax import lax
from jax.experimental import pallas as pl
from jax.experimental.pallas import tpu as pltpu

LANES = 128
MAX_TILE_ROWS = 2048  # 2048 x 128 x 4 B = 1 MiB per f32 input block


def _round_up(x, m):
    return (x + m - 1) // m * m


def _bce_kernel(w_ref, y_ref, out_ref, *, tile_rows, rows_valid, apply_falsify):
    """One grid step: BCE over a (tile_rows, 128) slab -> (1, 1, 128) lane partial sums.

    w_ref  : (tile_rows, 128) edge weights (f32 or bf16)
    y_ref  : (tile_rows, 128) target; bf16 0/1 on the falsify path, raw y otherwise
    out_ref: (1, 1, 128) f32 per-lane partial sums for this block
    """
    i = pl.program_id(0)
    w = w_ref[...].astype(jnp.float32)

    # Mask rows beyond the valid slab: the last (partial) block reads OOB
    # garbage in its tail rows.  Zero-padded rows inside the slab contribute
    # exactly 0 to the BCE sum, so row granularity is sufficient.
    row = i * tile_rows + lax.broadcasted_iota(jnp.int32, (tile_rows, LANES), 0)
    valid = row < rows_valid

    if apply_falsify:
        # y_ref already holds the falsified boolean target (computed together
        # with the pt gather in the wrapper) -> single-log BCE.
        take = y_ref[...] != 0
        p = jnp.where(take, w, 1.0 - w)
        per_edge = -jnp.maximum(jnp.log(p), jnp.float32(-100.0))
    else:
        # y passes through unchanged and may be fractional -> two-term BCE,
        # with torch's -100 clamp on each log term.
        y = y_ref[...].astype(jnp.float32)
        log_w = jnp.maximum(jnp.log(w), jnp.float32(-100.0))
        log_1mw = jnp.maximum(jnp.log(1.0 - w), jnp.float32(-100.0))
        per_edge = -(y * log_w + (1.0 - y) * log_1mw)

    per_edge = jnp.where(valid, per_edge, jnp.float32(0.0))
    out_ref[...] = jnp.sum(per_edge, axis=0).reshape(1, 1, LANES)


def falsify_low_pt_edge_weight_bce(w, y, edge_index=None, pt=None, pt_thld=0.0,
                                   max_tile_rows=MAX_TILE_ROWS):
    """w, y: (E,) float; edge_index: (2, E) int; pt: (H,) float. Returns scalar f32."""
    n_edges = int(w.shape[0])
    if n_edges == 0:
        # torch: mean-reduction over an empty tensor is NaN.
        return jnp.float32(float("nan"))

    apply_falsify = not math.isclose(float(pt_thld), 0.0)

    def _as_kernel_dtype(x):
        # bf16 passes through (halves HBM bytes); everything else -> f32.
        if x.dtype in (jnp.bfloat16, jnp.float32):
            return x
        return x.astype(jnp.float32)

    w_in = _as_kernel_dtype(w)
    if apply_falsify:
        assert edge_index is not None and pt is not None
        # Fold the threshold test into the (unavoidable) XLA gather so the
        # kernel only streams w plus a compact bf16 0/1 target.
        y_in = ((y != 0) & (pt[edge_index[0, :]] > jnp.asarray(pt_thld, pt.dtype))
                ).astype(jnp.bfloat16)
    else:
        y_in = _as_kernel_dtype(y)

    inputs = [w_in, y_in]

    # Native sublane granule: bf16 wants (16,128) tiles, f32 (8,128).
    granule = 16 if any(x.dtype == jnp.bfloat16 for x in inputs) else 8

    rows_needed = pl.cdiv(n_edges, LANES)
    rows_arr = max(rows_needed, granule)   # never let a block exceed the array
    e_arr = rows_arr * LANES

    tiled = []
    for x in inputs:
        if e_arr != n_edges:
            # Zero pad up to the next 128-multiple (w=0, y=0 contributes exactly
            # 0 to the BCE sum).  Skipped entirely when E % 128 == 0, so the
            # common large-graph case incurs no extra HBM copy.
            x = jnp.pad(x, (0, e_arr - n_edges))
        tiled.append(x.reshape(rows_arr, LANES))

    tile_rows = min(_round_up(max_tile_rows, granule),
                    (rows_arr // granule) * granule)
    num_blocks = pl.cdiv(rows_arr, tile_rows)

    kernel = functools.partial(
        _bce_kernel,
        tile_rows=tile_rows,
        rows_valid=rows_arr,
        apply_falsify=apply_falsify,
    )

    bytes_accessed = (sum(int(x.size) * x.dtype.itemsize for x in tiled)
                      + num_blocks * LANES * 4)
    cost = pl.CostEstimate(
        flops=6 * rows_arr * LANES,
        transcendentals=(1 if apply_falsify else 2) * rows_arr * LANES,
        bytes_accessed=bytes_accessed,
    )

    partials = pl.pallas_call(
        kernel,
        out_shape=jax.ShapeDtypeStruct((num_blocks, 1, LANES), jnp.float32),
        grid=(num_blocks,),
        in_specs=[pl.BlockSpec((tile_rows, LANES), lambda i: (i, 0))
                  for _ in tiled],
        out_specs=pl.BlockSpec((1, 1, LANES), lambda i: (i, 0, 0)),
        compiler_params=pltpu.CompilerParams(
            dimension_semantics=("parallel",)),
        cost_estimate=cost,
    )(*tiled)

    # Tiny epilogue: sum per-block lane partials, divide by the TRUE edge count.
    return jnp.sum(partials) / jnp.float32(n_edges)


def _reference(w, y, edge_index, pt, pt_thld):
    if math.isclose(float(pt_thld), 0.0):
        y_eff = y.astype(jnp.float32)
    else:
        y_eff = ((y != 0.0) & (pt[edge_index[0, :]] > pt_thld)).astype(jnp.float32)
    log_w = jnp.maximum(jnp.log(w), -100.0)
    log_1mw = jnp.maximum(jnp.log(1.0 - w), -100.0)
    return jnp.mean(-(y_eff * log_w + (1.0 - y_eff) * log_1mw))


if __name__ == "__main__":
    key = jax.random.PRNGKey(0)
    k_w, k_y, k_e, k_pt = jax.random.split(key, 4)

    n_hits = 64
    n_edges = 1000          # deliberately NOT a multiple of 128 (exercises padding)
    pt_thld = 0.9

    w = jax.random.uniform(k_w, (n_edges,), jnp.float32, 1e-3, 1.0 - 1e-3)
    y = (jax.random.uniform(k_y, (n_edges,)) > 0.5).astype(jnp.float32)
    edge_index = jax.random.randint(k_e, (2, n_edges), 0, n_hits, dtype=jnp.int32)
    pt = jax.random.uniform(k_pt, (n_hits,), jnp.float32, 0.0, 2.0)

    # Falsify path (pt_thld > 0), single-block.
    loss = falsify_low_pt_edge_weight_bce(w, y, edge_index, pt, pt_thld=pt_thld)
    loss = jax.block_until_ready(loss)
    ref = _reference(w, y, edge_index, pt, pt_thld)
    assert jnp.allclose(loss, ref, rtol=1e-5, atol=1e-6), (loss, ref)

    # No-threshold path (pt_thld == 0): kernel keeps y unchanged (two-term BCE).
    loss0 = falsify_low_pt_edge_weight_bce(w, y, edge_index, pt, pt_thld=0.0)
    loss0 = jax.block_until_ready(loss0)
    ref0 = _reference(w, y, edge_index, pt, 0.0)
    assert jnp.allclose(loss0, ref0, rtol=1e-5, atol=1e-6), (loss0, ref0)

    # Multi-block + ragged-last-block path (small tile override exercises the
    # in-kernel row mask and the "parallel" partial-sum output).
    loss_mb = falsify_low_pt_edge_weight_bce(w, y, edge_index, pt,
                                             pt_thld=pt_thld, max_tile_rows=16)
    loss_mb = jax.block_until_ready(loss_mb)
    assert jnp.allclose(loss_mb, ref, rtol=1e-5, atol=1e-6), (loss_mb, ref)

    print("KERNEL_OK")
</pallas_src>

<mosaic_0001>
module attributes {stable_mosaic.version = 11 : i64} {
  func.func @_bce_kernel(%arg0: i32, %arg1: memref<16x128xf32, #tpu.memory_space<vmem>>, %arg2: memref<16x128xbf16, #tpu.memory_space<vmem>>, %arg3: memref<1x1x128xf32, #tpu.memory_space<vmem>>) attributes {dimension_semantics = [#tpu.dimension_semantics<parallel>], iteration_bounds = array<i64: 1>, scalar_prefetch = 0 : i64, scratch_operands = 0 : i64, tpu.core_type = #tpu.core_type<tc>, window_params = [{transform_indices = @transform_0, window_bounds = array<i64: 16, 128>}, {transform_indices = @transform_1, window_bounds = array<i64: 16, 128>}, {transform_indices = @transform_2, window_bounds = array<i64: 1, 1, 128>}]} {
    %c0 = arith.constant 0 : index
    %c0_0 = arith.constant 0 : index
    %0 = vector.load %arg1[%c0, %c0_0] : memref<16x128xf32, #tpu.memory_space<vmem>>, vector<16x128xf32>
    %c16_i32 = arith.constant 16 : i32
    %1 = arith.muli %arg0, %c16_i32 : i32
    %2 = tpu.iota {dimensions = array<i32: 0>} : vector<16x128xi32>
    %3 = vector.broadcast %1 : i32 to vector<16x128xi32>
    %4 = arith.addi %3, %2 : vector<16x128xi32>
    %c16_i32_1 = arith.constant 16 : i32
    %5 = vector.broadcast %c16_i32_1 : i32 to vector<16x128xi32>
    %6 = arith.cmpi slt, %4, %5 : vector<16x128xi32>
    %c0_2 = arith.constant 0 : index
    %c0_3 = arith.constant 0 : index
    %7 = vector.load %arg2[%c0_2, %c0_3] : memref<16x128xbf16, #tpu.memory_space<vmem>>, vector<16x128xbf16>
    %cst = arith.constant 0.000000e+00 : bf16
    %8 = vector.broadcast %cst : bf16 to vector<16x128xbf16>
    %9 = arith.cmpf one, %7, %8 : vector<16x128xbf16>
    %cst_4 = arith.constant 1.000000e+00 : f32
    %10 = vector.broadcast %cst_4 : f32 to vector<16x128xf32>
    %11 = arith.subf %10, %0 : vector<16x128xf32>
    %12 = arith.select %9, %0, %11 : vector<16x128xi1>, vector<16x128xf32>
    %13 = math.log %12 : vector<16x128xf32>
    %cst_5 = arith.constant -1.000000e+02 : f32
    %14 = vector.broadcast %cst_5 : f32 to vector<16x128xf32>
    %15 = arith.maximumf %13, %14 : vector<16x128xf32>
    %cst_6 = arith.constant 0.000000e+00 : f32
    %16 = vector.broadcast %cst_6 : f32 to vector<16x128xf32>
    %17 = arith.subf %16, %15 : vector<16x128xf32>
    %cst_7 = arith.constant 0.000000e+00 : f32
    %18 = vector.broadcast %cst_7 : f32 to vector<16x128xf32>
    %19 = arith.select %6, %17, %18 : vector<16x128xi1>, vector<16x128xf32>
    %cst_8 = arith.constant dense<0.000000e+00> : vector<128xf32>
    %20 = vector.multi_reduction <add>, %19, %cst_8 [0] : vector<16x128xf32> to vector<128xf32>
    %21 = vector.shape_cast %20 : vector<128xf32> to vector<1x1x128xf32>
    %c0_9 = arith.constant 0 : index
    %c0_10 = arith.constant 0 : index
    %c0_11 = arith.constant 0 : index
    %22 = vector.load %arg3[%c0_9, %c0_10, %c0_11] : memref<1x1x128xf32, #tpu.memory_space<vmem>>, vector<1x1x128xf32>
    tpu.vector_store %arg3[%c0_9, %c0_10, %c0_11], %21 {strides = array<i32>} : memref<1x1x128xf32, #tpu.memory_space<vmem>>, vector<1x1x128xf32>,
    return
  }
  func.func @transform_0(%arg0: i32) -> (i32, i32) {
    %c0_i32 = arith.constant 0 : i32
    %c0_i32_0 = arith.constant 0 : i32
    return %arg0, %c0_i32 : i32, i32
  }
  func.func @transform_1(%arg0: i32) -> (i32, i32) {
    %c0_i32 = arith.constant 0 : i32
    %c0_i32_0 = arith.constant 0 : i32
    return %arg0, %c0_i32 : i32, i32
  }
  func.func @transform_2(%arg0: i32) -> (i32, i32, i32) {
    %c0_i32 = arith.constant 0 : i32
    %c0_i32_0 = arith.constant 0 : i32
    %c0_i32_1 = arith.constant 0 : i32
    return %arg0, %c0_i32, %c0_i32_0 : i32, i32, i32
  }
}

</mosaic_0001>

<bundles_post_ra>
// kernel: tpu_custom_call.1
= control target key start
LH: loop header
LB: loop body
LE: loop exit
PB: predicated region body
PF: predicated region fallthrough
CT: control target
= control target key end

     0   :  { %7 = vsyncpa [#allocation3], 0  ;;  %s212_s0 = inlined_call_operand.hbm [shape: f32[16,128], index: 0, kind: input, shape index: {}]   ;;  %s213_s1 = inlined_call_operand.hbm [shape: bf16[16,128], index: 1, kind: input, shape index: {}]   ;;  %s214_s2 = inlined_call_operand.hbm [shape: f32[1,1,128], index: 2, kind: output, shape index: {}]  }
   0x1   :  { %8 = vsyncpa [#allocation6], 0 }
   0x2   :  { %9 = vsyncpa [#allocation4], 0  ;;  %s180_s9 = smov [#allocation2]  }
   0x3   :  { %s15_s10 = sshll.u32 %s180_s9, 4  ;;  %s16_s10 = int_to_ptr.vmem [resolvable:$true] %s15_s10 }
   0x4   :  { %s122_s11 = scalar_lea.vmem %s16_s10, 256  ;;  %p127_p1 = scmp.lt.s32.totalorder %s16_s10, %s16_s10 }
   0x5   :  { %p123_p0 = scmp.ne.s32.totalorder %s16_s10, %s122_s11  ;;  %p128_p2 = scmp.lt.s32.totalorder %s122_s11, %s122_s11 }
   0x7   :  { %p129_p3 = por %p128_p2, %p127_p1 }
   0x9   :  { %p130_p4 = pnand %p129_p3, %p123_p0 }
   0xb   :  { %133 = shalt.err (!%p130_p4)
}
   0xc   :  { %s181_s12 = smov 128   ;;  %s182_s13 = smov 8  }
   0xd   :  { %21 = dma.hbm_to_vmem [thread:$0]  %s212_s0, 256, %s16_s10, [#allocation3], %s181_s12, %s181_s12, %s182_s13  }
   0xe   :  { %s183_s16 = smov [#allocation5]  }
   0xf   :  { %s27_s17 = sshll.u32 %s183_s16, 4  ;;  %s28_s17 = int_to_ptr.vmem [resolvable:$true] %s27_s17 }
  0x10   :  { %s142_s18 = scalar_lea.vmem %s28_s17, 128  ;;  %p147_p6 = scmp.lt.s32.totalorder %s28_s17, %s28_s17 }
  0x11   :  { %p143_p5 = scmp.ne.s32.totalorder %s28_s17, %s142_s18  ;;  %p148_p7 = scmp.lt.s32.totalorder %s142_s18, %s142_s18 }
  0x13   :  { %p149_p8 = por %p148_p7, %p147_p6 }
  0x15   :  { %p150_p9 = pnand %p149_p8, %p143_p5 }
  0x17   :  { %153 = shalt.err (!%p150_p9)
}
  0x18   :  { %s184_s19 = smov 64   ;;  %s185_s20 = smov 4  }
  0x19   :  { %33 = dma.hbm_to_vmem [thread:$0]  %s213_s1, 128, %s28_s17, [#allocation6], %s184_s19, %s184_s19, %s185_s20  }
  0x1a   :  { %174 = dma.done.wait [#allocation3], 256  }
  0x1b   :  { %175 = vsyncadd [#allocation3], 4294967040 }
  0x1c   :  { %176 = dma.done.wait [#allocation6], 128  }
  0x1d   :  { %177 = vsyncadd [#allocation6], 4294967168  ;;  %v43_v0 = vld [vmem:[#allocation2] sm:$0xff]  ;;  %v44_v1 = vld [vmem:[#allocation2 + $0x8] sm:$0xff]  ;;  %v186_v5 = vmov 0   ;;  %s187_s0 = smov [#allocation7]  }
  0x1e   :  { %v54_v2 = vld [vmem:[#allocation5] sm:$0xf]  ;;  %v55_v3 = vld [vmem:[#allocation5 + $0x4] sm:$0xf]  ;;  %v58_v4 = vsub.f32 1.0, %v43_v0  ;;  %v59_v7 = vsub.f32 1.0, %v44_v1 }
  0x1f   :  { %vm56_vm0 = vcmp.ne.bf16.partialorder %v54_v2, 0  ;;  %vm57_vm1 = vcmp.ne.bf16.partialorder %v55_v3, 0  ;;  %s92_s1 = sshll.u32 %s187_s0, 4  ;;  %s93_s1 = int_to_ptr.vmem [resolvable:$true] %s92_s1 }
  0x20   :  { %v60_v6 = vsel %vm56_vm0, 65537, %v186_v5  ;;  %v61_v8 = vsel %vm57_vm1, 65537, %v186_v5  ;;  %s154_s23 = scalar_lea.vmem %s93_s1, 16  ;;  %s158_s24 = scalar_lea.vmem %s93_s1, 32 }
  0x21   :  { %v62_v9 = vunpack.c.l.b16 %v60_v6  ;;  %v63_v10 = vunpack.c.l.b16 %v61_v8  ;;  %p155_p10 = scmp.ne.s32.totalorder %s93_s1, %s154_s23  ;;  %p159_p11 = scmp.lt.s32.totalorder %s93_s1, %s93_s1 }
  0x22   :  { %p160_p12 = scmp.lt.s32.totalorder %s158_s24, %s154_s23 }
  0x23   :  { %vm64_vm2 = vcmp.ne.s32.totalorder %v62_v9, 0  ;;  %vm65_vm3 = vcmp.ne.s32.totalorder %v63_v10, 0 }
  0x24   :  { %v66_v11 = vsel %vm64_vm2, %v43_v0, %v58_v4  ;;  %v67_v12 = vsel %vm65_vm3, %v44_v1, %v59_v7  ;;  %p161_p13 = por %p160_p12, %p159_p11 }
  0x25   :  { %110 = vlog2.f32 %v66_v11 }
  0x26   :  { %112 = vlog2.f32 %v67_v12  ;;  %p162_p0 = pnand %p161_p13, %p155_p10 }
  0x32   :  { %v111_v13 = vpop.eup %110 }
  0x33   :  { %v113_v14 = vpop.eup %112  ;;  %v69_v15 = vmul.f32 0.6931472, %v111_v13 }
  0x34   :  { %v71_v16 = vmul.f32 0.6931472, %v113_v14 }
  0x35   :  { %v72_v17 = vmax.f32 %v69_v15, -100.0 }
  0x36   :  { %v73_v18 = vmax.f32 %v71_v16, -100.0 }
  0x37   :  { %v74_v19 = vsub.f32 0.0, %v72_v17 }
  0x38   :  { %v75_v20 = vsub.f32 0.0, %v73_v18 }
  0x3a   :  { %v78_v21 = vadd.f32 %v75_v20, %v74_v19 }
  0x3c   :  { %v79_v22 = vrot.slane %v78_v21, 4 }
  0x3e   :  { %v80_v23 = vadd.f32 %v79_v22, %v78_v21 }
  0x40   :  { %v81_v24 = vrot.slane %v80_v23, 2 }
  0x42   :  { %v82_v25 = vadd.f32 %v81_v24, %v80_v23 }
  0x44   :  { %v83_v26 = vrot.slane %v82_v25, 1 }
  0x46   :  { %v84_v27 = vadd.f32 %v83_v26, %v82_v25 }
  0x48   :  { %85 = vst [vmem:[#allocation7] sm:$0x1] %v84_v27 }
  0x49   :  { %165 = shalt.err (!%p162_p0)
}
  0x4a   :  { %95 = dma.vmem_to_hbm [thread:$0]  %s93_s1, 16, %s214_s2, [#allocation4]  }
  0x4b   :  { %178 = dma.done.wait [#allocation4], 16  }
  0x4c   :  { %179 = vsyncadd [#allocation4], 4294967280 }
  0x4d   :  { %99 = vsyncpa [#allocation3], 1 }
  0x4e   :  { %100 = vsyncpa [#allocation6], 1 }
  0x4f   :  { %101 = vsyncpa [#allocation4], 1 }

</bundles_post_ra>
